<compile_context>
chip_gen: v6e
topology: v6e:2x2x1
jax: 0.10.0
libtpu: 0.0.40
codegen_flags: <defaults>
</compile_context>

<pallas_src>
import functools
import math

import jax
import jax.numpy as jnp
from jax.experimental import pallas as pl
from jax.experimental.pallas import tpu as pltpu

_LANES = 128


def _ln_rows_kernel(x_ref, w_ref, b_ref, o_ref, *, eps):
    """LayerNorm over the last axis; one kernel row == one logical row."""
    x = x_ref[...].astype(jnp.float32)
    mean = jnp.mean(x, axis=-1, keepdims=True)
    xc = x - mean
    var = jnp.mean(xc * xc, axis=-1, keepdims=True)      # biased, like torch
    inv = jax.lax.rsqrt(var + eps)
    y = xc * inv * w_ref[...] + b_ref[...]
    o_ref[...] = y.astype(o_ref.dtype)


def _ln_folded_kernel(x_ref, w_ref, b_ref, seg_ref, o_ref, *, eps, d):
    """LayerNorm where each 128-lane kernel row packs G = 128 // d logical rows.

    Segment sums are computed with a precomputed block-diagonal ones matrix on
    the (otherwise idle) MXU so loads/compute/stores stay lane-dense for small
    hidden dims. Variance uses E[x^2] - mean^2 so both matmuls are independent
    and can issue back-to-back.
    """
    x = x_ref[...].astype(jnp.float32)
    seg = seg_ref[...]
    inv_d = jnp.float32(1.0 / d)
    mean = jnp.dot(x, seg, preferred_element_type=jnp.float32,
                   precision=jax.lax.Precision.HIGHEST) * inv_d
    msq = jnp.dot(x * x, seg, preferred_element_type=jnp.float32,
                  precision=jax.lax.Precision.HIGHEST) * inv_d
    var = jnp.maximum(msq - mean * mean, 0.0)
    inv = jax.lax.rsqrt(var + eps)
    y = (x - mean) * inv * w_ref[...] + b_ref[...]
    o_ref[...] = y.astype(o_ref.dtype)


def _vmem_capacity_bytes():
    try:
        info = pltpu.get_tpu_info()
        cap = getattr(info, "vmem_capacity_bytes", None)
        if cap:
            return int(cap)
    except Exception:
        pass
    return 64 * 1024 * 1024  # conservative fallback (v7x per-core physical VMEM)


def _round_up(x, m):
    return -(-x // m) * m


def layer_norm_pallas(x, weight, bias, *, eps: float = 1e-5):
    """Equivalent of torch.nn.LayerNorm(D) over the trailing axis of x."""
    orig_shape = x.shape
    D = orig_shape[-1]
    rows = math.prod(orig_shape[:-1]) if len(orig_shape) > 1 else 1
    out_dtype = x.dtype
    itemsize = jnp.dtype(x.dtype).itemsize

    # Lane-dense layout: if D < 128 and divides 128, pack G rows per 128 lanes.
    folded = 0 < D < _LANES and _LANES % D == 0
    if folded:
        G = _LANES // D
        W = _LANES
        kernel = functools.partial(_ln_folded_kernel, eps=eps, d=D)
    else:
        # D >= 128 (ideally a multiple of 128) or a non-dividing small D.
        # TODO(synk): for D not a multiple of 128, pad the hidden dim to the
        # next 128 multiple at the model/caller level to avoid masked stores.
        G = 1
        W = D
        kernel = functools.partial(_ln_rows_kernel, eps=eps)

    x2 = x.reshape(rows, D)
    pad_rows = 0
    if folded and rows % G != 0:
        pad_rows = G - rows % G                     # at most G-1 rows
        x2 = jnp.pad(x2, ((0, pad_rows), (0, 0)))
    R_needed = (rows + pad_rows) // G               # kernel rows actually needed
    x2 = x2.reshape(R_needed, W)

    # Per-generation tile sizing from VMEM capacity, including f32 temporaries.
    vmem_cap = _vmem_capacity_bytes()
    vmem_limit = int(min((vmem_cap * 3) // 4, 100 * 1024 * 1024))
    pack = 8 if itemsize >= 4 else (16 if itemsize == 2 else 32)
    # Bytes/kernel-row: double-buffered in+out tiles + ~4 f32 working copies.
    per_row = 4 * W * itemsize + 16 * W
    tm_cap = max(pack, ((vmem_limit // 2) // per_row) // pack * pack)
    tm_cap = min(tm_cap, 1024)
    # Keep >= ~8 grid steps so v7x megacore can shard and DMAs overlap.
    tm_split = _round_up(pl.cdiv(R_needed, 8), pack)
    tm = max(pack, min(tm_cap, tm_split))
    if tm >= R_needed:
        tm = R_needed                               # single full-array block
    grid = (pl.cdiv(R_needed, tm),)

    # Hoist affine-param f32 cast and lane tiling out of the hot loop.
    w2 = jnp.tile(weight.astype(jnp.float32).reshape(-1), G).reshape(1, W)
    b2 = jnp.tile(bias.astype(jnp.float32).reshape(-1), G).reshape(1, W)

    in_specs = [
        pl.BlockSpec((tm, W), lambda i: (i, 0)),
        pl.BlockSpec((1, W), lambda i: (0, 0)),
        pl.BlockSpec((1, W), lambda i: (0, 0)),
    ]
    operands = [x2, w2, b2]
    if folded:
        # Block-diagonal ones matrix, built once on host, resident in VMEM
        # (constant index_map -> DMA'd once, 64 KiB).
        seg_idx = jnp.arange(W, dtype=jnp.int32) // D
        seg = (seg_idx[:, None] == seg_idx[None, :]).astype(jnp.float32)
        in_specs.append(pl.BlockSpec((W, W), lambda i: (0, 0)))
        operands.append(seg)

    out = pl.pallas_call(
        kernel,
        out_shape=jax.ShapeDtypeStruct((R_needed, W), out_dtype),
        grid=grid,
        in_specs=in_specs,
        out_specs=pl.BlockSpec((tm, W), lambda i: (i, 0)),
        compiler_params=pltpu.CompilerParams(
            dimension_semantics=("parallel",),
            vmem_limit_bytes=vmem_limit,
        ),
    )(*operands)

    out = out.reshape(R_needed * G, D)
    if pad_rows:
        out = out[:rows]
    return out.reshape(orig_shape)


def _reference_ln(x, weight, bias, eps=1e-5):
    mean = jnp.mean(x, axis=-1, keepdims=True)
    var = jnp.mean((x - mean) ** 2, axis=-1, keepdims=True)
    return (x - mean) * jax.lax.rsqrt(var + eps) * weight + bias


if __name__ == "__main__":
    # Small shapes implied by the module: batch=2, seq=8, hidden(dim)=32
    B, N, D = 2, 8, 32
    key = jax.random.PRNGKey(0)
    kx, kw, kb, kx2 = jax.random.split(key, 4)

    x = jax.random.normal(kx, (B, N, D), dtype=jnp.float32)
    # nn.LayerNorm default init: weight=ones, bias=zeros; perturb slightly so
    # the affine path is exercised.
    weight = jnp.ones((D,), jnp.float32) + 0.01 * jax.random.normal(kw, (D,), jnp.float32)
    bias = jnp.zeros((D,), jnp.float32) + 0.01 * jax.random.normal(kb, (D,), jnp.float32)

    y = jax.block_until_ready(layer_norm_pallas(x, weight, bias))
    y_ref = _reference_ln(x, weight, bias)
    err = float(jnp.max(jnp.abs(y - y_ref)))
    assert err < 5e-5, f"mismatch vs reference (folded path): {err}"

    # Also exercise the lane-aligned (D >= 128) path with a non-divisible
    # row count so the pad-free tail-block handling is covered.
    D2 = 256
    x_big = jax.random.normal(kx2, (3, 7, D2), dtype=jnp.float32)
    w_big = jnp.ones((D2,), jnp.float32)
    b_big = jnp.zeros((D2,), jnp.float32)
    y_big = jax.block_until_ready(layer_norm_pallas(x_big, w_big, b_big))
    err2 = float(jnp.max(jnp.abs(y_big - _reference_ln(x_big, w_big, b_big))))
    assert err2 < 5e-5, f"mismatch vs reference (row path): {err2}"

    print("KERNEL_OK")
</pallas_src>

<mosaic_0001>
module attributes {stable_mosaic.version = 11 : i64} {
  func.func @_ln_folded_kernel(%arg0: i32, %arg1: memref<4x128xf32, #tpu.memory_space<vmem>>, %arg2: memref<1x128xf32, #tpu.memory_space<vmem>>, %arg3: memref<1x128xf32, #tpu.memory_space<vmem>>, %arg4: memref<128x128xf32, #tpu.memory_space<vmem>>, %arg5: memref<4x128xf32, #tpu.memory_space<vmem>>) attributes {dimension_semantics = [#tpu.dimension_semantics<parallel>], iteration_bounds = array<i64: 1>, scalar_prefetch = 0 : i64, scratch_operands = 0 : i64, tpu.core_type = #tpu.core_type<tc>, window_params = [{transform_indices = @transform_0, window_bounds = array<i64: 4, 128>}, {pipeline_mode = #tpu.pipeline_mode<synchronous>, transform_indices = @transform_1, window_bounds = array<i64: 1, 128>}, {pipeline_mode = #tpu.pipeline_mode<synchronous>, transform_indices = @transform_2, window_bounds = array<i64: 1, 128>}, {pipeline_mode = #tpu.pipeline_mode<synchronous>, transform_indices = @transform_3, window_bounds = array<i64: 128, 128>}, {transform_indices = @transform_4, window_bounds = array<i64: 4, 128>}]} {
    %c0 = arith.constant 0 : index
    %c0_0 = arith.constant 0 : index
    %0 = vector.load %arg1[%c0, %c0_0] : memref<4x128xf32, #tpu.memory_space<vmem>>, vector<4x128xf32>
    %c0_1 = arith.constant 0 : index
    %c0_2 = arith.constant 0 : index
    %1 = vector.load %arg4[%c0_1, %c0_2] : memref<128x128xf32, #tpu.memory_space<vmem>>, vector<128x128xf32>
    %cst = arith.constant dense<0.000000e+00> : vector<4x128xf32>
    %2 = tpu.matmul %0, %1, %cst {dimension_numbers = #tpu.dot_dimension_numbers<[1], [0], [0], [1], [0, 0, 1, 1], [], []>, precision = #tpu.contract_precision<fp32>} : vector<4x128xf32>, vector<128x128xf32>, vector<4x128xf32> -> vector<4x128xf32>
    %cst_3 = arith.constant 3.125000e-02 : f32
    %3 = vector.broadcast %cst_3 : f32 to vector<4x128xf32>
    %4 = arith.mulf %2, %3 : vector<4x128xf32>
    %5 = arith.mulf %0, %0 : vector<4x128xf32>
    %cst_4 = arith.constant dense<0.000000e+00> : vector<4x128xf32>
    %6 = tpu.matmul %5, %1, %cst_4 {dimension_numbers = #tpu.dot_dimension_numbers<[1], [0], [0], [1], [0, 0, 1, 1], [], []>, precision = #tpu.contract_precision<fp32>} : vector<4x128xf32>, vector<128x128xf32>, vector<4x128xf32> -> vector<4x128xf32>
    %cst_5 = arith.constant 3.125000e-02 : f32
    %7 = vector.broadcast %cst_5 : f32 to vector<4x128xf32>
    %8 = arith.mulf %6, %7 : vector<4x128xf32>
    %9 = arith.mulf %4, %4 : vector<4x128xf32>
    %10 = arith.subf %8, %9 : vector<4x128xf32>
    %cst_6 = arith.constant 0.000000e+00 : f32
    %11 = vector.broadcast %cst_6 : f32 to vector<4x128xf32>
    %12 = arith.maximumf %10, %11 : vector<4x128xf32>
    %cst_7 = arith.constant 9.99999974E-6 : f32
    %13 = vector.broadcast %cst_7 : f32 to vector<4x128xf32>
    %14 = arith.addf %12, %13 : vector<4x128xf32>
    %15 = math.rsqrt %14 : vector<4x128xf32>
    %16 = arith.subf %0, %4 : vector<4x128xf32>
    %17 = arith.mulf %16, %15 : vector<4x128xf32>
    %c0_8 = arith.constant 0 : index
    %c0_9 = arith.constant 0 : index
    %18 = vector.load %arg2[%c0_8, %c0_9] : memref<1x128xf32, #tpu.memory_space<vmem>>, vector<1x128xf32>
    %19 = vector.broadcast %18 : vector<1x128xf32> to vector<4x128xf32>
    %20 = arith.mulf %17, %19 : vector<4x128xf32>
    %c0_10 = arith.constant 0 : index
    %c0_11 = arith.constant 0 : index
    %21 = vector.load %arg3[%c0_10, %c0_11] : memref<1x128xf32, #tpu.memory_space<vmem>>, vector<1x128xf32>
    %22 = vector.broadcast %21 : vector<1x128xf32> to vector<4x128xf32>
    %23 = arith.addf %20, %22 : vector<4x128xf32>
    %c0_12 = arith.constant 0 : index
    %c0_13 = arith.constant 0 : index
    %24 = vector.load %arg5[%c0_12, %c0_13] : memref<4x128xf32, #tpu.memory_space<vmem>>, vector<4x128xf32>
    tpu.vector_store %arg5[%c0_12, %c0_13], %23 {strides = array<i32>} : memref<4x128xf32, #tpu.memory_space<vmem>>, vector<4x128xf32>,
    return
  }
  func.func @transform_0(%arg0: i32) -> (i32, i32) {
    %c0_i32 = arith.constant 0 : i32
    %c0_i32_0 = arith.constant 0 : i32
    return %arg0, %c0_i32 : i32, i32
  }
  func.func @transform_1(%arg0: i32) -> (i32, i32) {
    %c0_i32 = arith.constant 0 : i32
    %c0_i32_0 = arith.constant 0 : i32
    %c0_i32_1 = arith.constant 0 : i32
    return %c0_i32, %c0_i32_0 : i32, i32
  }
  func.func @transform_2(%arg0: i32) -> (i32, i32) {
    %c0_i32 = arith.constant 0 : i32
    %c0_i32_0 = arith.constant 0 : i32
    %c0_i32_1 = arith.constant 0 : i32
    return %c0_i32, %c0_i32_0 : i32, i32
  }
  func.func @transform_3(%arg0: i32) -> (i32, i32) {
    %c0_i32 = arith.constant 0 : i32
    %c0_i32_0 = arith.constant 0 : i32
    %c0_i32_1 = arith.constant 0 : i32
    return %c0_i32, %c0_i32_0 : i32, i32
  }
  func.func @transform_4(%arg0: i32) -> (i32, i32) {
    %c0_i32 = arith.constant 0 : i32
    %c0_i32_0 = arith.constant 0 : i32
    return %arg0, %c0_i32 : i32, i32
  }
}

</mosaic_0001>

<bundles_post_ra>
// kernel: tpu_custom_call.1
= control target key start
LH: loop header
LB: loop body
LE: loop exit
PB: predicated region body
PF: predicated region fallthrough
CT: control target
= control target key end

     0   :  { %9 = vsyncpa [#allocation3], 0  ;;  %s2771_s0 = inlined_call_operand.hbm [shape: f32[4,128], index: 0, kind: input, shape index: {}]   ;;  %s2772_s1 = inlined_call_operand.vmem [shape: f32[1,128], index: 1, kind: input, shape index: {}]   ;;  %s2773_s2 = inlined_call_operand.vmem [shape: f32[1,128], index: 2, kind: input, shape index: {}]   ;;  %s2774_s3 = inlined_call_operand.hbm [shape: f32[128,128], index: 3, kind: input, shape index: {}]   ;;  %s2775_s4 = inlined_call_operand.hbm [shape: f32[4,128], index: 4, kind: output, shape index: {}]  }
   0x1   :  { %10 = vsyncpa [#allocation6], 0 }
   0x2   :  { %11 = vsyncpa [#allocation4], 0  ;;  %s2087_s15 = smov [#allocation2]   ;;  %s2088_s17 = smov [#allocation5]  }
   0x3   :  { %s18_s16 = sshll.u32 %s2087_s15, 4  ;;  %s31_s18 = sshll.u32 %s2088_s17, 4  ;;  %s19_s16 = int_to_ptr.vmem [resolvable:$true] %s18_s16  ;;  %s32_s18 = int_to_ptr.vmem [resolvable:$true] %s31_s18 }
   0x4   :  { %s2029_s19 = scalar_lea.vmem %s19_s16, 64  ;;  %p2034_p1 = scmp.lt.s32.totalorder %s19_s16, %s19_s16 }
   0x5   :  { %p2030_p0 = scmp.ne.s32.totalorder %s19_s16, %s2029_s19  ;;  %p2035_p2 = scmp.lt.s32.totalorder %s2029_s19, %s2029_s19 }
   0x7   :  { %p2036_p3 = por %p2035_p2, %p2034_p1 }
   0x9   :  { %p2037_p4 = pnand %p2036_p3, %p2030_p0 }
   0xb   :  { %2040 = shalt.err (!%p2037_p4)
}
   0xc   :  { %21 = dma.hbm_to_vmem [thread:$0]  %s2771_s0, 64, %s19_s16, [#allocation3]  }
   0xd   :  { %s2049_s22 = scalar_lea.vmem %s32_s18, 2048  ;;  %p2054_p6 = scmp.lt.s32.totalorder %s32_s18, %s32_s18 }
   0xe   :  { %p2050_p5 = scmp.ne.s32.totalorder %s32_s18, %s2049_s22  ;;  %p2055_p7 = scmp.lt.s32.totalorder %s2049_s22, %s2049_s22 }
  0x10   :  { %p2056_p8 = por %p2055_p7, %p2054_p6 }
  0x12   :  { %p2057_p9 = pnand %p2056_p8, %p2050_p5 }
  0x14   :  { %2060 = shalt.err (!%p2057_p9)
}
  0x15   :  { %s2089_s23 = smov 128   ;;  %s2090_s24 = smov 8  }
  0x16   :  { %37 = dma.hbm_to_vmem [thread:$0]  %s2774_s3, 2048, %s32_s18, [#allocation6], %s2089_s23, %s2089_s23, %s2090_s24  }
  0x17   :  { %2081 = dma.done.wait [#allocation3], 64  }
  0x18   :  { %2082 = vsyncadd [#allocation3], 4294967232 }
  0x19   :  { %2083 = dma.done.wait [#allocation6], 2048  }
  0x1a   :  { %2084 = vsyncadd [#allocation6], 4294965248  ;;  %v2091_v0 = vmov 0.0   ;;  %vm2092_vm0 = vmmov 0   ;;  %v60_v1 = vld [vmem:[#allocation5 + $0x78] sm:$0xff]  ;;  %v59_v2 = vld [vmem:[#allocation5 + $0x70] sm:$0xff] }
  0x1b   :  { %1592 = vmatprep.subr.mxu0 %v2091_v0  ;;  %1627 = vmatprep.subr.mxu1 %v2091_v0  ;;  %v58_v3 = vld [vmem:[#allocation5 + $0x68] sm:$0xff]  ;;  %v2131_v4 = vand.u32 4294901760, %v60_v1  ;;  %v2133_v5 = vand.u32 4294901760, %v59_v2  ;;  %v57_v7 = vld [vmem:[#allocation5 + $0x60] sm:$0xff]  ;;  %v56_v8 = vld [vmem:[#allocation5 + $0x58] sm:$0xff]  ;;  %s2093_s29 = smov [#allocation7]  }
  0x1c   :  { %1624 = vmatprep.mubr.msk.f32.mxu0 %vm2092_vm0, %v2091_v0  ;;  %1659 = vmatprep.mubr.msk.f32.mxu1 %vm2092_vm0, %v2091_v0  ;;  %v2135_v6 = vand.u32 4294901760, %v58_v3  ;;  %v55_v9 = vld [vmem:[#allocation5 + $0x50] sm:$0xff]  ;;  %v2137_v10 = vand.u32 4294901760, %v57_v7  ;;  %v2139_v11 = vand.u32 4294901760, %v56_v8  ;;  %v54_v13 = vld [vmem:[#allocation5 + $0x48] sm:$0xff]  ;;  %v53_v14 = vld [vmem:[#allocation5 + $0x40] sm:$0xff] }
  0x1d   :  { %v2141_v12 = vand.u32 4294901760, %v55_v9  ;;  %1593 = vmatpush3.msra.mxu0 %v2131_v4  ;;  %v2145_v15 = vsub.f32 %v60_v1, %v2131_v4  ;;  %v2148_v16 = vsub.f32 %v59_v2, %v2133_v5  ;;  %v2150_v17 = vand.u32 4294901760, %v54_v13  ;;  %v52_v19 = vld [vmem:[#allocation5 + $0x38] sm:$0xff]  ;;  %v51_v26 = vld [vmem:[#allocation5 + $0x30] sm:$0xff]  ;;  %v50_v36 = vld [vmem:[#allocation5 + $0x28] sm:$0xff]  ;;  %s1376_s30 = sshll.u32 %s2093_s29, 4  ;;  %s1377_s30 = int_to_ptr.vmem [resolvable:$true] %s1376_s30 }
  0x1e   :  { %v2153_v18 = vsub.f32 %v58_v3, %v2135_v6  ;;  %1594 = vmatprep.subr.mxu0 %v2091_v0  ;;  %v2157_v20 = vsub.f32 %v57_v7, %v2137_v10  ;;  %v2160_v21 = vsub.f32 %v56_v8, %v2139_v11  ;;  %v2172_v25 = vand.u32 4294901760, %v53_v14  ;;  %v49_v41 = vld [vmem:[#allocation5 + $0x20] sm:$0xff]  ;;  %v48_v49 = vld [vmem:[#allocation5 + $0x18] sm:$0xff]  ;;  %v47_v54 = vld [vmem:[#allocation5 + $0x10] sm:$0xff]  ;;  %s2061_s5 = scalar_lea.vmem %s1377_s30, 64  ;;  %p2066_p11 = scmp.lt.s32.totalorder %s1377_s30, %s1377_s30 }
  0x1f   :  { %1595 = vmatpush3.msra.mxu0 %v2133_v5  ;;  %v2164_v22 = vand.u32 4294901760, %v2145_v15  ;;  %v2167_v23 = vand.u32 4294901760, %v2148_v16  ;;  %v2178_v28 = vand.u32 4294901760, %v52_v19  ;;  %v2184_v30 = vsub.f32 %v55_v9, %v2141_v12  ;;  %v2231_v50 = vld [vmem:[#allocation2] sm:$0xf]  ;;  %v46_v60 = vld [vmem:[#allocation5 + $0x8] sm:$0xff]  ;;  %p2062_p10 = scmp.ne.s32.totalorder %s1377_s30, %s2061_s5  ;;  %p2067_p12 = scmp.lt.s32.totalorder %s2061_s5, %s2061_s5 }
  0x20   :  { %v2170_v24 = vand.u32 4294901760, %v2153_v18  ;;  %1596 = vmatprep.subr.mxu0 %v2091_v0  ;;  %v2176_v27 = vand.u32 4294901760, %v2157_v20  ;;  %v2181_v29 = vand.u32 4294901760, %v2160_v21  ;;  %v2194_v34 = vsub.f32 %v54_v13, %v2150_v17  ;;  %v45_v7 = vld [vmem:[#allocation5] sm:$0xff] }
  0x21   :  { %1597 = vmatpush3.msra.mxu0 %v2135_v6  ;;  %v156_v31 = vsub.f32 %v2145_v15, %v2164_v22  ;;  %v163_v32 = vsub.f32 %v2148_v16, %v2167_v23  ;;  %v2197_v35 = vand.u32 4294901760, %v51_v26  ;;  %v2207_v40 = vand.u32 4294901760, %v2184_v30  ;;  %p2068_p13 = por %p2067_p12, %p2066_p11 }
  0x22   :  { %v170_v33 = vsub.f32 %v2153_v18, %v2170_v24  ;;  %1598 = vmatprep.subr.mxu0 %v2091_v0  ;;  %v177_v39 = vsub.f32 %v2157_v20, %v2176_v27  ;;  %v184_v42 = vsub.f32 %v2160_v21, %v2181_v29  ;;  %v2213_v43 = vsub.f32 %v53_v14, %v2172_v25 }
  0x23   :  { %1599 = vmatpush3.msra.mxu0 %v2137_v10  ;;  %v2200_v37 = vand.u32 4294901760, %v156_v31  ;;  %v2202_v38 = vand.u32 4294901760, %v163_v32  ;;  %v2219_v45 = vand.u32 4294901760, %v50_v36  ;;  %v2222_v46 = vand.u32 4294901760, %v2194_v34  ;;  %p2069_p0 = pnand %p2068_p13, %p2062_p10 }
  0x24   :  { %1600 = vmatprep.subr.mxu0 %v2091_v0  ;;  %v2217_v44 = vand.u32 4294901760, %v170_v33  ;;  %v2225_v47 = vsub.f32 %v52_v19, %v2178_v28  ;;  %v2229_v48 = vand.u32 4294901760, %v49_v41  ;;  %v2235_v51 = vand.u32 4294901760, %v177_v39 }
  0x25   :  { %1601 = vmatpush3.msra.mxu0 %v2139_v11  ;;  %1628 = vmatpush3.msra.mxu1 %v2200_v37  ;;  %v191_v52 = vsub.f32 %v2184_v30, %v2207_v40  ;;  %v2240_v53 = vand.u32 4294901760, %v2213_v43  ;;  %v2243_v55 = vsub.f32 %v51_v26, %v2197_v35  ;;  %v2247_v56 = vand.u32 4294901760, %v184_v42 }
  0x26   :  { %2784 = vst [vmem:[#allocation11_spill] sm:$0xff] %v2217_v44  ;;  %1602 = vmatprep.subr.mxu0 %v2091_v0  ;;  %1629 = vmatprep.subr.mxu1 %v2091_v0  ;;  %2785 = vst [vmem:[#allocation12_spill] sm:$0xff] %v2235_v51  ;;  %v2250_v57 = vand.u32 4294901760, %v2225_v47  ;;  %v198_v58 = vsub.f32 %v2194_v34, %v2222_v46  ;;  %v2256_v59 = vand.u32 4294901760, %v48_v49  ;;  %v2262_v62 = vand.u32 4294901760, %v2231_v50 }
  0x27   :  { %1603 = vmatpush3.msra.mxu0 %v2141_v12  ;;  %1630 = vmatpush3.msra.mxu1 %v2202_v38  ;;  %2786 = vst [vmem:[#allocation13_spill] sm:$0xff] %v2247_v56  ;;  %v2259_v61 = vsub.f32 %v50_v36, %v2219_v45  ;;  %v2266_v63 = vand.u32 4294901760, %v47_v54  ;;  %v2270_v1 = vand.u32 4294901760, %v191_v52  ;;  %v205_v2 = vsub.f32 %v2213_v43, %v2240_v53 }
  0x28   :  { %1604 = vmatprep.subr.mxu0 %v2091_v0  ;;  %1631 = vmatprep.subr.mxu1 %v2091_v0  ;;  %v2275_v3 = vand.u32 4294901760, %v2243_v55  ;;  %v2278_v8 = vsub.f32 %v49_v41, %v2229_v48  ;;  %v212_v9 = vsub.f32 %v2225_v47, %v2250_v57  ;;  %v2284_v13 = vand.u32 4294901760, %v46_v60 }
  0x29   :  { %1605 = vmatpush3.msra.mxu0 %v2150_v17  ;;  %1632 = vmatpush3.msra.mxu1 %v2217_v44  ;;  %2787 = vst [vmem:[#allocation14_spill] sm:$0xff] %v2270_v1  ;;  %v2288_v14 = vand.u32 4294901760, %v198_v58  ;;  %v2291_v19 = vand.u32 4294901760, %v2259_v61  ;;  %v2295_v26 = vsub.f32 %v2231_v50, %v2262_v62  ;;  %v2298_v31 = vsub.f32 %v48_v49, %v2256_v59 }
  0x2a   :  { %1606 = vmatprep.subr.mxu0 %v2091_v0  ;;  %1633 = vmatprep.subr.mxu1 %v2091_v0  ;;  %v2302_v32 = vand.u32 4294901760, %v45_v7  ;;  %v2306_v33 = vand.u32 4294901760, %v205_v2  ;;  %v219_v36 = vsub.f32 %v2243_v55, %v2275_v3  ;;  %v2311_v39 = vand.u32 4294901760, %v2278_v8 }
  0x2b   :  { %1607 = vmatpush3.msra.mxu0 %v2172_v25  ;;  %1634 = vmatpush3.msra.mxu1 %v2235_v51  ;;  %2788 = vst [vmem:[#allocation15_spill] sm:$0xff] %v2288_v14  ;;  %v2314_v41 = vsub.f32 %v47_v54, %v2266_v63  ;;  %v2318_v42 = vand.u32 4294901760, %v212_v9  ;;  %v226_v49 = vsub.f32 %v2259_v61, %v2291_v19  ;;  %v2326_v58 = vand.u32 4294901760, %v2298_v31 }
  0x2c   :  { %1608 = vmatprep.subr.mxu0 %v2091_v0  ;;  %1635 = vmatprep.subr.mxu1 %v2091_v0  ;;  %2789 = vst [vmem:[#allocation16_spill] sm:$0xff] %v2306_v33  ;;  %v2329_v54 = vsub.f32 %v46_v60, %v2284_v13  ;;  %v2335_v2 = vand.u32 4294901760, %v219_v36  ;;  %v233_v9 = vsub.f32 %v2278_v8, %v2311_v39  ;;  %v2792_v36 = vand.u32 4294901760, %v2295_v26 }
  0x2d   :  { %1609 = vmatpush3.msra.mxu0 %v2178_v28  ;;  %1636 = vmatpush3.msra.mxu1 %v2247_v56  ;;  %2790 = vst [vmem:[#allocation17_spill] sm:$0xff] %v2318_v42  ;;  %v2340_v52 = vand.u32 4294901760, %v2314_v41  ;;  %v2349_v60 = vand.u32 4294901760, %v226_v49 }
  0x2e   :  { %1610 = vmatprep.subr.mxu0 %v2091_v0  ;;  %1637 = vmatprep.subr.mxu1 %v2091_v0  ;;  %2791 = vst [vmem:[#allocation18_spill] sm:$0xff] %v2335_v2  ;;  %v2363_v49 = vand.u32 4294901760, %v233_v9 }
  0x2f   :  { %1611 = vmatpush3.msra.mxu0 %v2197_v35  ;;  %1638 = vmatpush3.msra.mxu1 %v2270_v1  ;;  %v240_v1 = vsub.f32 %v2298_v31, %v2326_v58 }
  0x30   :  { %1612 = vmatprep.subr.mxu0 %v2091_v0  ;;  %1639 = vmatprep.subr.mxu1 %v2091_v0 }
  0x31   :  { %1613 = vmatpush3.msra.mxu0 %v2219_v45  ;;  %1640 = vmatpush3.msra.mxu1 %v2288_v14  ;;  %v2343_v14 = vsub.f32 %v45_v7, %v2302_v32  ;;  %v2357_v7 = vand.u32 4294901760, %v2329_v54  ;;  %v2374_v51 = vand.u32 4294901760, %v240_v1 }
  0x32   :  { %1614 = vmatprep.subr.mxu0 %v2091_v0  ;;  %1641 = vmatprep.subr.mxu1 %v2091_v0 }
  0x33   :  { %1615 = vmatpush3.msra.mxu0 %v2229_v48  ;;  %1642 = vmatpush3.msra.mxu1 %v2306_v33  ;;  %v145_v33 = vsub.f32 %v2295_v26, %v2792_v36  ;;  %v2368_v36 = vand.u32 4294901760, %v2343_v14  ;;  %v254_v9 = vsub.f32 %v2329_v54, %v2357_v7 }
  0x34   :  { %1616 = vmatprep.subr.mxu0 %v2091_v0  ;;  %1643 = vmatprep.subr.mxu1 %v2091_v0 }
  0x35   :  { %1617 = vmatpush3.msra.mxu0 %v2256_v59  ;;  %1644 = vmatpush3.msra.mxu1 %v2318_v42  ;;  %v247_v42 = vsub.f32 %v2314_v41, %v2340_v52  ;;  %v146_v56 = vand.u32 4294901760, %v145_v33  ;;  %v261_v44 = vsub.f32 %v2343_v14, %v2368_v36  ;;  %v2389_v1 = vand.u32 4294901760, %v254_v9  ;;  %v2797_v9 = vld [vmem:[#allocation14_spill] sm:$0xff] }
  0x36   :  { %1618 = vmatprep.subr.mxu0 %v2091_v0  ;;  %1645 = vmatprep.subr.mxu1 %v2091_v0 }
  0x37   :  { %1619 = vmatpush3.msra.mxu0 %v2266_v63  ;;  %1646 = vmatpush3.msra.mxu1 %v2335_v2  ;;  %v2382_v2 = vand.u32 4294901760, %v247_v42  ;;  %v2395_v33 = vand.u32 4294901760, %v261_v44  ;;  %v2793_v44 = vand.u32 4294901760, %v2295_v26 }
  0x38   :  { %1620 = vmatprep.subr.mxu0 %v2091_v0  ;;  %1647 = vmatprep.subr.mxu1 %v2091_v0 }
  0x39   :  { %1621 = vmatpush3.msra.mxu0 %v2284_v13  ;;  %1648 = vmatpush3.msra.mxu1 %v2349_v60 }
  0x3a   :  { %1622 = vmatprep.subr.mxu0 %v2091_v0  ;;  %1649 = vmatprep.subr.mxu1 %v2091_v0 }
  0x3b   :  { %1623 = vmatpush3.msra.mxu0 %v2302_v32  ;;  %1650 = vmatpush3.msra.mxu1 %v2363_v49 }
  0x3c   :  { %1651 = vmatprep.subr.mxu1 %v2091_v0  ;;  %1662 = vmatprep.subr.mxu0 %v2091_v0 }
  0x3d   :  { %1625 = vmatmul.mubr.f32.vlgmr.msra.gmra.mxu0 %v146_v56  ;;  %1652 = vmatpush3.msra.mxu1 %v2374_v51  ;;  %v703_v56 = vmul.f32 %v2231_v50, %v2231_v50 }
  0x3e   :  { %1663 = vmatpush3.msra.mxu0 %v2145_v15  ;;  %1653 = vmatprep.subr.mxu1 %v2091_v0 }
  0x3f   :  { %1664 = vmatprep.subr.mxu0 %v2091_v0  ;;  %1654 = vmatpush3.msra.mxu1 %v2382_v2 }
  0x40   :  { %1665 = vmatpush3.msra.mxu0 %v2148_v16  ;;  %1655 = vmatprep.subr.mxu1 %v2091_v0 }
  0x41   :  { %1666 = vmatprep.subr.mxu0 %v2091_v0  ;;  %1656 = vmatpush3.msra.mxu1 %v2389_v1 }
  0x42   :  { %1667 = vmatpush3.msra.mxu0 %v2153_v18  ;;  %1657 = vmatprep.subr.mxu1 %v2091_v0 }
  0x43   :  { %1668 = vmatprep.subr.mxu0 %v2091_v0  ;;  %1658 = vmatpush3.msra.mxu1 %v2395_v33 }
  0x44   :  { %1669 = vmatpush3.msra.mxu0 %v2157_v20  ;;  %1660 = vmatmul.mubr.f32.vlgmr.msra.gmra.mxu1 %v2262_v62 }
  0x45   :  { %1670 = vmatprep.subr.mxu0 %v2091_v0  ;;  %1697 = vmatprep.subr.mxu1 %v2091_v0 }
  0x46   :  { %1671 = vmatpush3.msra.mxu0 %v2160_v21  ;;  %1698 = vmatpush3.msra.mxu1 %v2131_v4 }
  0x47   :  { %1672 = vmatprep.subr.mxu0 %v2091_v0  ;;  %1699 = vmatprep.subr.mxu1 %v2091_v0 }
  0x48   :  { %1673 = vmatpush3.msra.mxu0 %v2184_v30  ;;  %1700 = vmatpush3.msra.mxu1 %v2133_v5 }
  0x49   :  { %1674 = vmatprep.subr.mxu0 %v2091_v0  ;;  %1701 = vmatprep.subr.mxu1 %v2091_v0 }
  0x4a   :  { %1675 = vmatpush3.msra.mxu0 %v2194_v34  ;;  %1702 = vmatpush3.msra.mxu1 %v2135_v6 }
  0x4b   :  { %1676 = vmatprep.subr.mxu0 %v2091_v0  ;;  %1703 = vmatprep.subr.mxu1 %v2091_v0 }
  0x4c   :  { %1677 = vmatpush3.msra.mxu0 %v2213_v43  ;;  %1704 = vmatpush3.msra.mxu1 %v2137_v10 }
  0x4d   :  { %1678 = vmatprep.subr.mxu0 %v2091_v0  ;;  %1705 = vmatprep.subr.mxu1 %v2091_v0 }
  0x4e   :  { %1679 = vmatpush3.msra.mxu0 %v2225_v47  ;;  %1706 = vmatpush3.msra.mxu1 %v2139_v11 }
  0x4f   :  { %1680 = vmatprep.subr.mxu0 %v2091_v0  ;;  %1707 = vmatprep.subr.mxu1 %v2091_v0 }
  0x50   :  { %1681 = vmatpush3.msra.mxu0 %v2243_v55  ;;  %1708 = vmatpush3.msra.mxu1 %v2141_v12 }
  0x51   :  { %1682 = vmatprep.subr.mxu0 %v2091_v0  ;;  %1709 = vmatprep.subr.mxu1 %v2091_v0 }
  0x52   :  { %1683 = vmatpush3.msra.mxu0 %v2259_v61  ;;  %1710 = vmatpush3.msra.mxu1 %v2150_v17 }
  0x53   :  { %1684 = vmatprep.subr.mxu0 %v2091_v0  ;;  %1711 = vmatprep.subr.mxu1 %v2091_v0 }
  0x54   :  { %1685 = vmatpush3.msra.mxu0 %v2278_v8  ;;  %1712 = vmatpush3.msra.mxu1 %v2172_v25 }
  0x55   :  { %1686 = vmatprep.subr.mxu0 %v2091_v0  ;;  %1713 = vmatprep.subr.mxu1 %v2091_v0 }
  0x56   :  { %1687 = vmatpush3.msra.mxu0 %v2298_v31  ;;  %1714 = vmatpush3.msra.mxu1 %v2178_v28 }
  0x57   :  { %1688 = vmatprep.subr.mxu0 %v2091_v0  ;;  %1715 = vmatprep.subr.mxu1 %v2091_v0 }
  0x58   :  { %1689 = vmatpush3.msra.mxu0 %v2314_v41  ;;  %1716 = vmatpush3.msra.mxu1 %v2197_v35 }
  0x59   :  { %1690 = vmatprep.subr.mxu0 %v2091_v0  ;;  %1717 = vmatprep.subr.mxu1 %v2091_v0 }
  0x5a   :  { %1691 = vmatpush3.msra.mxu0 %v2329_v54  ;;  %1718 = vmatpush3.msra.mxu1 %v2219_v45 }
  0x5b   :  { %1692 = vmatprep.subr.mxu0 %v2091_v0  ;;  %1719 = vmatprep.subr.mxu1 %v2091_v0 }
  0x5c   :  { %1693 = vmatpush3.msra.mxu0 %v2343_v14  ;;  %1694 = vmatprep.mubr.msk.f32.mxu0 %vm2092_vm0, %v2091_v0 }
  0x5d   :  { %1720 = vmatpush3.msra.mxu1 %v2229_v48  ;;  %1695 = vmatmul.mubr.f32.vlgmr.msra.gmra.mxu0 %v2295_v26  ;;  %v2795_v26 = vld [vmem:[#allocation12_spill] sm:$0xff] }
  0x5e   :  { %1721 = vmatprep.subr.mxu1 %v2091_v0  ;;  %1732 = vmatprep.subr.mxu0 %v2091_v0 }
  0x5f   :  { %1722 = vmatpush3.msra.mxu1 %v2256_v59  ;;  %1733 = vmatpush3.msra.mxu0 %v2164_v22 }
  0x60   :  { %1723 = vmatprep.subr.mxu1 %v2091_v0  ;;  %1734 = vmatprep.subr.mxu0 %v2091_v0 }
  0x61   :  { %1724 = vmatpush3.msra.mxu1 %v2266_v63  ;;  %1735 = vmatpush3.msra.mxu0 %v2167_v23 }
  0x62   :  { %1725 = vmatprep.subr.mxu1 %v2091_v0  ;;  %1736 = vmatprep.subr.mxu0 %v2091_v0 }
  0x63   :  { %1726 = vmatpush3.msra.mxu1 %v2284_v13  ;;  %1737 = vmatpush3.msra.mxu0 %v2170_v24 }
  0x64   :  { %1727 = vmatprep.subr.mxu1 %v2091_v0  ;;  %1738 = vmatprep.subr.mxu0 %v2091_v0 }
  0x65   :  { %1728 = vmatpush3.msra.mxu1 %v2302_v32  ;;  %1729 = vmatprep.mubr.msk.f32.mxu1 %vm2092_vm0, %v2091_v0 }
  0x66   :  { %1739 = vmatpush3.msra.mxu0 %v2176_v27  ;;  %1730 = vmatmul.mubr.f32.vlgmr.msra.gmra.mxu1 %v2793_v44  ;;  %v2798_v44 = vld [vmem:[#allocation15_spill] sm:$0xff] }
  0x67   :  { %1740 = vmatprep.subr.mxu0 %v2091_v0  ;;  %1767 = vmatprep.subr.mxu1 %v2091_v0 }
  0x68   :  { %1741 = vmatpush3.msra.mxu0 %v2181_v29  ;;  %1768 = vmatpush3.msra.mxu1 %v2131_v4 }
  0x69   :  { %1742 = vmatprep.subr.mxu0 %v2091_v0  ;;  %1769 = vmatprep.subr.mxu1 %v2091_v0 }
  0x6a   :  { %1743 = vmatpush3.msra.mxu0 %v2207_v40  ;;  %1770 = vmatpush3.msra.mxu1 %v2133_v5 }
  0x6b   :  { %1744 = vmatprep.subr.mxu0 %v2091_v0  ;;  %1771 = vmatprep.subr.mxu1 %v2091_v0 }
  0x6c   :  { %1745 = vmatpush3.msra.mxu0 %v2222_v46  ;;  %1772 = vmatpush3.msra.mxu1 %v2135_v6 }
  0x6d   :  { %1746 = vmatprep.subr.mxu0 %v2091_v0  ;;  %1773 = vmatprep.subr.mxu1 %v2091_v0 }
  0x6e   :  { %1747 = vmatpush3.msra.mxu0 %v2240_v53  ;;  %1774 = vmatpush3.msra.mxu1 %v2137_v10 }
  0x6f   :  { %1748 = vmatprep.subr.mxu0 %v2091_v0  ;;  %1775 = vmatprep.subr.mxu1 %v2091_v0 }
  0x70   :  { %1749 = vmatpush3.msra.mxu0 %v2250_v57  ;;  %1776 = vmatpush3.msra.mxu1 %v2139_v11 }
  0x71   :  { %1750 = vmatprep.subr.mxu0 %v2091_v0  ;;  %1777 = vmatprep.subr.mxu1 %v2091_v0 }
  0x72   :  { %1751 = vmatpush3.msra.mxu0 %v2275_v3  ;;  %1778 = vmatpush3.msra.mxu1 %v2141_v12 }
  0x73   :  { %1752 = vmatprep.subr.mxu0 %v2091_v0  ;;  %1779 = vmatprep.subr.mxu1 %v2091_v0 }
  0x74   :  { %1753 = vmatpush3.msra.mxu0 %v2291_v19  ;;  %1780 = vmatpush3.msra.mxu1 %v2150_v17 }
  0x75   :  { %1754 = vmatprep.subr.mxu0 %v2091_v0  ;;  %1781 = vmatprep.subr.mxu1 %v2091_v0 }
  0x76   :  { %1755 = vmatpush3.msra.mxu0 %v2311_v39  ;;  %1782 = vmatpush3.msra.mxu1 %v2172_v25 }
  0x77   :  { %1756 = vmatprep.subr.mxu0 %v2091_v0  ;;  %1783 = vmatprep.subr.mxu1 %v2091_v0 }
  0x78   :  { %1757 = vmatpush3.msra.mxu0 %v2326_v58  ;;  %1784 = vmatpush3.msra.mxu1 %v2178_v28 }
  0x79   :  { %1758 = vmatprep.subr.mxu0 %v2091_v0  ;;  %1785 = vmatprep.subr.mxu1 %v2091_v0 }
  0x7a   :  { %1759 = vmatpush3.msra.mxu0 %v2340_v52  ;;  %1786 = vmatpush3.msra.mxu1 %v2197_v35 }
  0x7b   :  { %1760 = vmatprep.subr.mxu0 %v2091_v0  ;;  %1787 = vmatprep.subr.mxu1 %v2091_v0 }
  0x7c   :  { %1761 = vmatpush3.msra.mxu0 %v2357_v7  ;;  %1788 = vmatpush3.msra.mxu1 %v2219_v45 }
  0x7d   :  { %1762 = vmatprep.subr.mxu0 %v2091_v0  ;;  %1789 = vmatprep.subr.mxu1 %v2091_v0 }
  0x7e   :  { %1763 = vmatpush3.msra.mxu0 %v2368_v36  ;;  %1764 = vmatprep.mubr.msk.f32.mxu0 %vm2092_vm0, %v2091_v0 }
  0x7f   :  { %1790 = vmatpush3.msra.mxu1 %v2229_v48  ;;  %1765 = vmatmul.mubr.f32.vlgmr.msra.gmra.mxu0 %v2262_v62 }
  0x80   :  { %1791 = vmatprep.subr.mxu1 %v2091_v0  ;;  %1802 = vmatprep.subr.mxu0 %v2091_v0 }
  0x81   :  { %1792 = vmatpush3.msra.mxu1 %v2256_v59  ;;  %1803 = vmatpush3.msra.mxu0 %v2131_v4 }
  0x82   :  { %1793 = vmatprep.subr.mxu1 %v2091_v0  ;;  %1804 = vmatprep.subr.mxu0 %v2091_v0 }
  0x83   :  { %1794 = vmatpush3.msra.mxu1 %v2266_v63  ;;  %1805 = vmatpush3.msra.mxu0 %v2133_v5 }
  0x84   :  { %1795 = vmatprep.subr.mxu1 %v2091_v0  ;;  %1806 = vmatprep.subr.mxu0 %v2091_v0 }
  0x85   :  { %1796 = vmatpush3.msra.mxu1 %v2284_v13  ;;  %1807 = vmatpush3.msra.mxu0 %v2135_v6 }
  0x86   :  { %1797 = vmatprep.subr.mxu1 %v2091_v0  ;;  %1808 = vmatprep.subr.mxu0 %v2091_v0 }
  0x87   :  { %1798 = vmatpush3.msra.mxu1 %v2302_v32  ;;  %1799 = vmatprep.mubr.msk.f32.mxu1 %vm2092_vm0, %v2091_v0 }
  0x88   :  { %1809 = vmatpush3.msra.mxu0 %v2137_v10  ;;  %1800 = vmatmul.mubr.f32.vlgmr.msra.gmra.mxu1 %v2262_v62  ;;  %v2794_v62 = vld [vmem:[#allocation11_spill] sm:$0xff] }
  0x89   :  { %1810 = vmatprep.subr.mxu0 %v2091_v0  ;;  %1837 = vmatprep.subr.mxu1 %v2091_v0 }
  0x8a   :  { %1811 = vmatpush3.msra.mxu0 %v2139_v11  ;;  %1838 = vmatpush3.msra.mxu1 %v2200_v37  ;;  %v2562_v37 = vand.u32 4294901760, %v703_v56 }
  0x8b   :  { %1812 = vmatprep.subr.mxu0 %v2091_v0  ;;  %1839 = vmatprep.subr.mxu1 %v2091_v0 }
  0x8c   :  { %1813 = vmatpush3.msra.mxu0 %v2141_v12  ;;  %1840 = vmatpush3.msra.mxu1 %v2202_v38  ;;  %v2796_v38 = vld [vmem:[#allocation13_spill] sm:$0xff]  ;;  %v2573_v42 = vsub.f32 %v703_v56, %v2562_v37  ;;  %v2799_v56 = vld [vmem:[#allocation16_spill] sm:$0xff] }
  0x8d   :  { %1814 = vmatprep.subr.mxu0 %v2091_v0  ;;  %1841 = vmatprep.subr.mxu1 %v2091_v0 }
  0x8e   :  { %1815 = vmatpush3.msra.mxu0 %v2150_v17  ;;  %1842 = vmatpush3.msra.mxu1 %v2794_v62  ;;  %v787_v62 = vand.u32 4294901760, %v2573_v42 }
  0x8f   :  { %1816 = vmatprep.subr.mxu0 %v2091_v0  ;;  %1843 = vmatprep.subr.mxu1 %v2091_v0 }
  0x90   :  { %1817 = vmatpush3.msra.mxu0 %v2172_v25  ;;  %1844 = vmatpush3.msra.mxu1 %v2795_v26  ;;  %v2800_v26 = vld [vmem:[#allocation17_spill] sm:$0xff] }
  0x91   :  { %1818 = vmatprep.subr.mxu0 %v2091_v0  ;;  %1845 = vmatprep.subr.mxu1 %v2091_v0 }
  0x92   :  { %1819 = vmatpush3.msra.mxu0 %v2178_v28  ;;  %1846 = vmatpush3.msra.mxu1 %v2796_v38  ;;  %v788_v38 = vsub.f32 %v2573_v42, %v787_v62 }
  0x93   :  { %1820 = vmatprep.subr.mxu0 %v2091_v0  ;;  %1847 = vmatprep.subr.mxu1 %v2091_v0 }
  0x94   :  { %1821 = vmatpush3.msra.mxu0 %v2197_v35  ;;  %1848 = vmatpush3.msra.mxu1 %v2797_v9  ;;  %v2801_v9 = vld [vmem:[#allocation18_spill] sm:$0xff] }
  0x95   :  { %1822 = vmatprep.subr.mxu0 %v2091_v0  ;;  %1849 = vmatprep.subr.mxu1 %v2091_v0 }
  0x96   :  { %1823 = vmatpush3.msra.mxu0 %v2219_v45  ;;  %1850 = vmatpush3.msra.mxu1 %v2798_v44  ;;  %v789_v44 = vand.u32 4294901760, %v788_v38 }
  0x97   :  { %1824 = vmatprep.subr.mxu0 %v2091_v0  ;;  %1851 = vmatprep.subr.mxu1 %v2091_v0 }
  0x98   :  { %1825 = vmatpush3.msra.mxu0 %v2229_v48  ;;  %1852 = vmatpush3.msra.mxu1 %v2799_v56 }
  0x99   :  { %1826 = vmatprep.subr.mxu0 %v2091_v0  ;;  %1853 = vmatprep.subr.mxu1 %v2091_v0 }
  0x9a   :  { %1827 = vmatpush3.msra.mxu0 %v2256_v59  ;;  %1854 = vmatpush3.msra.mxu1 %v2800_v26 }
  0x9b   :  { %1828 = vmatprep.subr.mxu0 %v2091_v0  ;;  %1855 = vmatprep.subr.mxu1 %v2091_v0 }
  0x9c   :  { %1829 = vmatpush3.msra.mxu0 %v2266_v63  ;;  %1856 = vmatpush3.msra.mxu1 %v2801_v9 }
  0x9d   :  { %1830 = vmatprep.subr.mxu0 %v2091_v0  ;;  %1857 = vmatprep.subr.mxu1 %v2091_v0 }
  0x9e   :  { %1831 = vmatpush3.msra.mxu0 %v2284_v13  ;;  %1858 = vmatpush3.msra.mxu1 %v2349_v60 }
  0x9f   :  { %1832 = vmatprep.subr.mxu0 %v2091_v0  ;;  %1859 = vmatprep.subr.mxu1 %v2091_v0 }
  0xa0   :  { %1833 = vmatpush3.msra.mxu0 %v2302_v32  ;;  %1860 = vmatpush3.msra.mxu1 %v2363_v49 }
  0xa1   :  { %1834 = vmatprep.mubr.msk.f32.mxu0 %vm2092_vm0, %v2091_v0  ;;  %1861 = vmatprep.subr.mxu1 %v2091_v0 }
  0xa2   :  { %1872 = vmatprep.subr.mxu0 %v2091_v0  ;;  %1835 = vmatmul.mubr.f32.vlgmr.msra.gmra.mxu0 %v789_v44 }
  0xa3   :  { %1862 = vmatpush3.msra.mxu1 %v2374_v51  ;;  %1873 = vmatpush3.msra.mxu0 %v2145_v15 }
  0xa4   :  { %1863 = vmatprep.subr.mxu1 %v2091_v0  ;;  %1874 = vmatprep.subr.mxu0 %v2091_v0 }
  0xa5   :  { %1864 = vmatpush3.msra.mxu1 %v2382_v2  ;;  %1875 = vmatpush3.msra.mxu0 %v2148_v16 }
  0xa6   :  { %1865 = vmatprep.subr.mxu1 %v2091_v0  ;;  %1876 = vmatprep.subr.mxu0 %v2091_v0 }
  0xa7   :  { %1866 = vmatpush3.msra.mxu1 %v2389_v1  ;;  %1877 = vmatpush3.msra.mxu0 %v2153_v18 }
  0xa8   :  { %1867 = vmatprep.subr.mxu1 %v2091_v0  ;;  %1878 = vmatprep.subr.mxu0 %v2091_v0 }
  0xa9   :  { %1868 = vmatpush3.msra.mxu1 %v2395_v33  ;;  %1869 = vmatprep.mubr.msk.f32.mxu1 %vm2092_vm0, %v2091_v0 }
  0xaa   :  { %1879 = vmatpush3.msra.mxu0 %v2157_v20  ;;  %1870 = vmatmul.mubr.f32.vlgmr.msra.gmra.mxu1 %v2562_v37 }
  0xab   :  { %1880 = vmatprep.subr.mxu0 %v2091_v0  ;;  %1907 = vmatprep.subr.mxu1 %v2091_v0 }
  0xac   :  { %1881 = vmatpush3.msra.mxu0 %v2160_v21  ;;  %1908 = vmatpush3.msra.mxu1 %v2131_v4 }
  0xad   :  { %1882 = vmatprep.subr.mxu0 %v2091_v0  ;;  %1909 = vmatprep.subr.mxu1 %v2091_v0 }
  0xae   :  { %1883 = vmatpush3.msra.mxu0 %v2184_v30  ;;  %1910 = vmatpush3.msra.mxu1 %v2133_v5 }
  0xaf   :  { %1884 = vmatprep.subr.mxu0 %v2091_v0  ;;  %1911 = vmatprep.subr.mxu1 %v2091_v0 }
  0xb0   :  { %1885 = vmatpush3.msra.mxu0 %v2194_v34  ;;  %1912 = vmatpush3.msra.mxu1 %v2135_v6 }
  0xb1   :  { %1886 = vmatprep.subr.mxu0 %v2091_v0  ;;  %1913 = vmatprep.subr.mxu1 %v2091_v0 }
  0xb2   :  { %1887 = vmatpush3.msra.mxu0 %v2213_v43  ;;  %1914 = vmatpush3.msra.mxu1 %v2137_v10 }
  0xb3   :  { %1888 = vmatprep.subr.mxu0 %v2091_v0  ;;  %1915 = vmatprep.subr.mxu1 %v2091_v0 }
  0xb4   :  { %1889 = vmatpush3.msra.mxu0 %v2225_v47  ;;  %1916 = vmatpush3.msra.mxu1 %v2139_v11 }
  0xb5   :  { %1890 = vmatprep.subr.mxu0 %v2091_v0  ;;  %1917 = vmatprep.subr.mxu1 %v2091_v0 }
  0xb6   :  { %1891 = vmatpush3.msra.mxu0 %v2243_v55  ;;  %1918 = vmatpush3.msra.mxu1 %v2141_v12 }
  0xb7   :  { %1892 = vmatprep.subr.mxu0 %v2091_v0  ;;  %1919 = vmatprep.subr.mxu1 %v2091_v0 }
  0xb8   :  { %1893 = vmatpush3.msra.mxu0 %v2259_v61  ;;  %1920 = vmatpush3.msra.mxu1 %v2150_v17 }
  0xb9   :  { %1894 = vmatprep.subr.mxu0 %v2091_v0  ;;  %1921 = vmatprep.subr.mxu1 %v2091_v0 }
  0xba   :  { %1895 = vmatpush3.msra.mxu0 %v2278_v8  ;;  %1922 = vmatpush3.msra.mxu1 %v2172_v25 }
  0xbb   :  { %1896 = vmatprep.subr.mxu0 %v2091_v0  ;;  %1923 = vmatprep.subr.mxu1 %v2091_v0 }
  0xbc   :  { %1897 = vmatpush3.msra.mxu0 %v2298_v31  ;;  %1924 = vmatpush3.msra.mxu1 %v2178_v28 }
  0xbd   :  { %1898 = vmatprep.subr.mxu0 %v2091_v0  ;;  %1925 = vmatprep.subr.mxu1 %v2091_v0 }
  0xbe   :  { %1899 = vmatpush3.msra.mxu0 %v2314_v41  ;;  %1926 = vmatpush3.msra.mxu1 %v2197_v35  ;;  %v1387_v41 = vld [vmem:[%s2773_s2] ss:$0 sm:$0xff] }
  0xbf   :  { %1900 = vmatprep.subr.mxu0 %v2091_v0  ;;  %1927 = vmatprep.subr.mxu1 %v2091_v0 }
  0xc0   :  { %1901 = vmatpush3.msra.mxu0 %v2329_v54  ;;  %1928 = vmatpush3.msra.mxu1 %v2219_v45 }
  0xc1   :  { %1902 = vmatprep.subr.mxu0 %v2091_v0  ;;  %1929 = vmatprep.subr.mxu1 %v2091_v0 }
  0xc2   :  { %1903 = vmatpush3.msra.mxu0 %v2343_v14  ;;  %1904 = vmatprep.mubr.msk.f32.mxu0 %vm2092_vm0, %v2091_v0 }
  0xc3   :  { %1930 = vmatpush3.msra.mxu1 %v2229_v48  ;;  %1905 = vmatmul.mubr.f32.vlgmr.msra.gmra.mxu0 %v2573_v42 }
  0xc4   :  { %1931 = vmatprep.subr.mxu1 %v2091_v0  ;;  %1942 = vmatprep.subr.mxu0 %v2091_v0 }
  0xc5   :  { %1932 = vmatpush3.msra.mxu1 %v2256_v59  ;;  %1943 = vmatpush3.msra.mxu0 %v2164_v22 }
  0xc6   :  { %1933 = vmatprep.subr.mxu1 %v2091_v0  ;;  %1944 = vmatprep.subr.mxu0 %v2091_v0 }
  0xc7   :  { %1934 = vmatpush3.msra.mxu1 %v2266_v63  ;;  %1945 = vmatpush3.msra.mxu0 %v2167_v23 }
  0xc8   :  { %1935 = vmatprep.subr.mxu1 %v2091_v0  ;;  %1946 = vmatprep.subr.mxu0 %v2091_v0 }
  0xc9   :  { %1936 = vmatpush3.msra.mxu1 %v2284_v13  ;;  %1947 = vmatpush3.msra.mxu0 %v2170_v24 }
  0xca   :  { %1937 = vmatprep.subr.mxu1 %v2091_v0  ;;  %1948 = vmatprep.subr.mxu0 %v2091_v0 }
  0xcb   :  { %1938 = vmatpush3.msra.mxu1 %v2302_v32  ;;  %1939 = vmatprep.mubr.msk.f32.mxu1 %vm2092_vm0, %v2091_v0 }
  0xcc   :  { %1949 = vmatpush3.msra.mxu0 %v2176_v27  ;;  %1940 = vmatmul.mubr.f32.vlgmr.msra.gmra.mxu1 %v787_v62 }
  0xcd   :  { %1950 = vmatprep.subr.mxu0 %v2091_v0  ;;  %1977 = vmatprep.subr.mxu1 %v2091_v0 }
  0xce   :  { %1951 = vmatpush3.msra.mxu0 %v2181_v29  ;;  %1978 = vmatpush3.msra.mxu1 %v2131_v4 }
  0xcf   :  { %1952 = vmatprep.subr.mxu0 %v2091_v0  ;;  %1979 = vmatprep.subr.mxu1 %v2091_v0 }
  0xd0   :  { %1953 = vmatpush3.msra.mxu0 %v2207_v40  ;;  %1980 = vmatpush3.msra.mxu1 %v2133_v5 }
  0xd1   :  { %1954 = vmatprep.subr.mxu0 %v2091_v0  ;;  %1981 = vmatprep.subr.mxu1 %v2091_v0 }
  0xd2   :  { %1955 = vmatpush3.msra.mxu0 %v2222_v46  ;;  %1982 = vmatpush3.msra.mxu1 %v2135_v6 }
  0xd3   :  { %1956 = vmatprep.subr.mxu0 %v2091_v0  ;;  %1983 = vmatprep.subr.mxu1 %v2091_v0 }
  0xd4   :  { %1957 = vmatpush3.msra.mxu0 %v2240_v53  ;;  %1984 = vmatpush3.msra.mxu1 %v2137_v10 }
  0xd5   :  { %1958 = vmatprep.subr.mxu0 %v2091_v0  ;;  %1985 = vmatprep.subr.mxu1 %v2091_v0 }
  0xd6   :  { %1959 = vmatpush3.msra.mxu0 %v2250_v57  ;;  %1986 = vmatpush3.msra.mxu1 %v2139_v11 }
  0xd7   :  { %1960 = vmatprep.subr.mxu0 %v2091_v0  ;;  %1987 = vmatprep.subr.mxu1 %v2091_v0 }
  0xd8   :  { %1961 = vmatpush3.msra.mxu0 %v2275_v3  ;;  %1988 = vmatpush3.msra.mxu1 %v2141_v12 }
  0xd9   :  { %1962 = vmatprep.subr.mxu0 %v2091_v0  ;;  %1989 = vmatprep.subr.mxu1 %v2091_v0 }
  0xda   :  { %1963 = vmatpush3.msra.mxu0 %v2291_v19  ;;  %1990 = vmatpush3.msra.mxu1 %v2150_v17 }
  0xdb   :  { %1964 = vmatprep.subr.mxu0 %v2091_v0  ;;  %1991 = vmatprep.subr.mxu1 %v2091_v0 }
  0xdc   :  { %1965 = vmatpush3.msra.mxu0 %v2311_v39  ;;  %1992 = vmatpush3.msra.mxu1 %v2172_v25 }
  0xdd   :  { %1966 = vmatprep.subr.mxu0 %v2091_v0  ;;  %1993 = vmatprep.subr.mxu1 %v2091_v0 }
  0xde   :  { %1967 = vmatpush3.msra.mxu0 %v2326_v58  ;;  %1994 = vmatpush3.msra.mxu1 %v2178_v28 }
  0xdf   :  { %1968 = vmatprep.subr.mxu0 %v2091_v0  ;;  %1995 = vmatprep.subr.mxu1 %v2091_v0 }
  0xe0   :  { %1969 = vmatpush3.msra.mxu0 %v2340_v52  ;;  %1996 = vmatpush3.msra.mxu1 %v2197_v35 }
  0xe1   :  { %1970 = vmatprep.subr.mxu0 %v2091_v0  ;;  %1997 = vmatprep.subr.mxu1 %v2091_v0 }
  0xe2   :  { %1971 = vmatpush3.msra.mxu0 %v2357_v7  ;;  %1998 = vmatpush3.msra.mxu1 %v2219_v45 }
  0xe3   :  { %1972 = vmatprep.subr.mxu0 %v2091_v0  ;;  %1999 = vmatprep.subr.mxu1 %v2091_v0 }
  0xe4   :  { %1973 = vmatpush3.msra.mxu0 %v2368_v36  ;;  %1974 = vmatprep.mubr.msk.f32.mxu0 %vm2092_vm0, %v2091_v0 }
  0xe5   :  { %2000 = vmatpush3.msra.mxu1 %v2229_v48  ;;  %1975 = vmatmul.mubr.f32.vlgmr.msra.gmra.mxu0 %v2562_v37 }
  0xe6   :  { %2001 = vmatprep.subr.mxu1 %v2091_v0  ;;  %2009 = vmatprep.mubr.msk.f32.mxu1 %vm2092_vm0, %v2091_v0 }
  0xe7   :  { %2002 = vmatpush3.msra.mxu1 %v2256_v59 }
  0xe8   :  { %2003 = vmatprep.subr.mxu1 %v2091_v0 }
  0xe9   :  { %2004 = vmatpush3.msra.mxu1 %v2266_v63 }
  0xea   :  { %2005 = vmatprep.subr.mxu1 %v2091_v0 }
  0xeb   :  { %2006 = vmatpush3.msra.mxu1 %v2284_v13 }
  0xec   :  { %2007 = vmatprep.subr.mxu1 %v2091_v0 }
  0xed   :  { %2008 = vmatpush3.msra.mxu1 %v2302_v32  ;;  %v1386_v32 = vld [vmem:[%s2772_s1] ss:$0 sm:$0xff] }
  0xee   :  { %2010 = vmatmul.mubr.f32.vlgmr.msra.gmra.mxu1 %v2562_v37 }
  0xfd   :  { %v148_v4 = vpop.f32.mrf.mxu0 }
  0xff   :  { %v1626_v5 = vpop.f32.mrf.mxu0 }
 0x104   :  { %v299_v6 = vpop.f32.mrf.mxu1 }
 0x105   :  { %v300_v10 = vadd.f32 %v299_v6, %v148_v4 }
 0x106   :  { %v1661_v11 = vpop.f32.mrf.mxu1 }
 0x11d   :  { %v403_v12 = vpop.f32.mrf.mxu0 }
 0x11e   :  { %v404_v15 = vadd.f32 %v403_v12, %v300_v10 }
 0x11f   :  { %v1696_v16 = vpop.f32.mrf.mxu0 }
 0x126   :  { %v492_v17 = vpop.f32.mrf.mxu1 }
 0x127   :  { %v493_v18 = vadd.f32 %v492_v17, %v404_v15 }
 0x128   :  { %v1731_v20 = vpop.f32.mrf.mxu1 }
 0x13f   :  { %v611_v21 = vpop.f32.mrf.mxu0 }
 0x140   :  { %v612_v22 = vadd.f32 %v611_v21, %v493_v18 }
 0x141   :  { %v1766_v23 = vpop.f32.mrf.mxu0 }
 0x148   :  { %v698_v24 = vpop.f32.mrf.mxu1 }
 0x149   :  { %v699_v0 = vadd.f32 %v698_v24, %v612_v22 }
 0x14a   :  { %v1801_v25 = vpop.f32.mrf.mxu1 }
 0x14b   :  { %v702_v53 = vmul.f32 0.03125, %v699_v0 }
 0x14d   :  { %v1346_v63 = vmul.f32 %v702_v53, %v702_v53  ;;  %v1351_v19 = vsub.f32 %v2231_v50, %v702_v53 }
 0x162   :  { %v791_v27 = vpop.f32.mrf.mxu0 }
 0x164   :  { %v1836_v28 = vpop.f32.mrf.mxu0 }
 0x16a   :  { %v942_v29 = vpop.f32.mrf.mxu1 }
 0x16b   :  { %v943_v46 = vadd.f32 %v942_v29, %v791_v27 }
 0x16c   :  { %v1871_v30 = vpop.f32.mrf.mxu1 }
 0x183   :  { %v1046_v34 = vpop.f32.mrf.mxu0 }
 0x184   :  { %v1047_v48 = vadd.f32 %v1046_v34, %v943_v46 }
 0x185   :  { %v1906_v35 = vpop.f32.mrf.mxu0 }
 0x18c   :  { %v1135_v40 = vpop.f32.mrf.mxu1 }
 0x18d   :  { %v1136_v51 = vadd.f32 %v1135_v40, %v1047_v48 }
 0x18e   :  { %v1941_v43 = vpop.f32.mrf.mxu1 }
 0x1a5   :  { %v1254_v45 = vpop.f32.mrf.mxu0 }
 0x1a6   :  { %v1255_v55 = vadd.f32 %v1254_v45, %v1136_v51 }
 0x1a7   :  { %v1976_v47 = vpop.f32.mrf.mxu0 }
 0x1ae   :  { %v1341_v57 = vpop.f32.mrf.mxu1 }
 0x1af   :  { %v1342_v59 = vadd.f32 %v1341_v57, %v1255_v55 }
 0x1b0   :  { %v2011_v61 = vpop.f32.mrf.mxu1 }
 0x1b1   :  { %v1345_v3 = vmul.f32 0.03125, %v1342_v59 }
 0x1b3   :  { %v1347_v8 = vsub.f32 %v1345_v3, %v1346_v63 }
 0x1b5   :  { %v1348_v13 = vmax.f32 %v1347_v8, 0.0 }
 0x1b7   :  { %v1349_v14 = vadd.f32 1e-05, %v1348_v13 }
 0x1b9   :  { %2019 = vrsqrt.f32 %v1349_v14 }
 0x1c6   :  { %v2020_v31 = vpop.eup %2019 }
 0x1c7   :  { %v1352_v39 = vmul.f32 %v2020_v31, %v1351_v19 }
 0x1c9   :  { %v1360_v52 = vmul.f32 %v1386_v32, %v1352_v39 }
 0x1cb   :  { %v1368_v58 = vadd.f32 %v1387_v41, %v1360_v52 }
 0x1cd   :  { %1369 = vst [vmem:[#allocation7] sm:$0xf] %v1368_v58 }
 0x1ce   :  { %2072 = shalt.err (!%p2069_p0)
}
 0x1cf   :  { %1379 = dma.vmem_to_hbm [thread:$0]  %s1377_s30, 64, %s2775_s4, [#allocation4]  }
 0x1d0   :  { %2085 = dma.done.wait [#allocation4], 64  }
 0x1d1   :  { %2086 = vsyncadd [#allocation4], 4294967232 }
 0x1d2   :  { %1383 = vsyncpa [#allocation3], 1 }
 0x1d3   :  { %1384 = vsyncpa [#allocation6], 1 }
 0x1d4   :  { %1385 = vsyncpa [#allocation4], 1 }

</bundles_post_ra>
